<compile_context>
chip_gen: v7x
topology: tpu7x:2x2x1
jax: 0.10.0
libtpu: 0.0.40
codegen_flags: <defaults>
</compile_context>

<pallas_src>
import jax
import jax.numpy as jnp
from jax.experimental import pallas as pl
from jax.experimental.pallas import tpu as pltpu

# ----- module-consistent configuration ---------------------------------------
V_SIZE = 512       # number of words in the vocabulary
CV_SIZE = 20       # character vocabulary size
CP_IDX = 0         # padding character index
CE_SIZE = 16       # character embedding size
WE_SIZE = 32       # word embedding size (must be divisible by 4)
MAX_LEN = 8        # padded spelling length L (>= 6); L*CE = 128 = one lane row
KERNEL_SIZES = (3, 4, 5, 6)
WE4 = WE_SIZE // 4
R_MAX = MAX_LEN - KERNEL_SIZES[0] + 1   # 6 pooled time positions (widest branch)
PAD_W = 128        # lane-padded slab / output width (WE=32 padded to 128)
TV = 128           # words per Pallas tile -> grid = V_SIZE // TV = 4


def _cnn_maxpool_kernel(emb_ref, w_ref, b_ref, out_ref):
    """Fused 4-branch Conv1d + MaxPool1d(time) + concat via one banded matmul.

    emb_ref : (TV, L*CE)       bf16  lane-dense character embeddings
    w_ref   : (L*CE, R*PAD_W)  bf16  banded conv weights (slab r = pooled pos r)
    b_ref   : (1, PAD_W)       f32   concatenated conv biases (lane-padded)
    out_ref : (TV, PAD_W)      f32   [m3 | m4 | m5 | m6 | 0...] per word
    """
    fused = jnp.dot(emb_ref[...], w_ref[...],
                    preferred_element_type=jnp.float32)        # (TV, R*PAD_W)
    r_max = w_ref.shape[1] // PAD_W
    m = fused[:, 0:PAD_W]
    for r in range(1, r_max):                                  # static, small
        m = jnp.maximum(m, fused[:, r * PAD_W:(r + 1) * PAD_W])  # lane-aligned
    # Conv bias is constant over time, so adding it AFTER the max-pool is
    # mathematically identical to PyTorch's conv(+bias) -> maxpool.
    out_ref[...] = m + b_ref[...]


def cnn_representer_pallas(emb_flat, w_big, bias_pad):
    """emb_flat: (V, L*CE) bf16 -> lane-padded word embeddings (V, PAD_W) f32."""
    V, K = emb_flat.shape
    cols = w_big.shape[1]
    assert V % TV == 0

    return pl.pallas_call(
        _cnn_maxpool_kernel,
        out_shape=jax.ShapeDtypeStruct((V, PAD_W), jnp.float32),
        grid_spec=pltpu.PrefetchScalarGridSpec(
            num_scalar_prefetch=0,
            grid=(V // TV,),
            in_specs=[
                pl.BlockSpec((TV, K), lambda i: (i, 0)),     # emb tile
                pl.BlockSpec((K, cols), lambda i: (0, 0)),   # fused weights
                pl.BlockSpec((1, PAD_W), lambda i: (0, 0)),  # fused bias
            ],
            out_specs=pl.BlockSpec((TV, PAD_W), lambda i: (i, 0)),
        ),
        compiler_params=pltpu.CompilerParams(
            dimension_semantics=("parallel",),
            # Per-step VMEM is ~1.2 MiB (double-buffered tiles + weights +
            # fused intermediate) -- well inside v7x's 64 MiB physical VMEM.
            vmem_limit_bytes=32 * 1024 * 1024,
        ),
    )(emb_flat, w_big, bias_pad)


def build_fused_weight(conv_ws, L, ce, we4, pad_w, r_max):
    """Stack (k, CE, WE4) conv weights into one banded (L*CE, r_max*pad_w) matrix."""
    w_big = jnp.zeros((L * ce, r_max * pad_w), jnp.float32)
    for b, w in enumerate(conv_ws):            # branch b -> kernel size 3+b
        k = w.shape[0]
        t_out = L - k + 1
        for r in range(r_max):
            t = r if r < t_out else 0          # duplicate t=0: neutral under max
            c0 = r * pad_w + b * we4
            for j in range(k):
                w_big = w_big.at[(t + j) * ce:(t + j + 1) * ce,
                                 c0:c0 + we4].set(w[j])
    return w_big


def build_fused_bias(conv_bs, we4, pad_w):
    b = jnp.zeros((1, pad_w), jnp.float32)
    for i, bb in enumerate(conv_bs):
        b = b.at[:, i * we4:(i + 1) * we4].set(bb)
    return b


def _reference_cnn(emb, conv_ws, conv_bs):
    """Pure-JAX reference of cnn_representer (per-branch conv + maxpool + concat)."""
    V, L, _ = emb.shape
    pieces = []
    for w, b in zip(conv_ws, conv_bs):
        k = w.shape[0]
        t_out = L - k + 1
        outs = []
        for t in range(t_out):
            s = sum(jnp.dot(emb[:, t + j, :], w[j],
                            precision=jax.lax.Precision.HIGHEST)
                    for j in range(k)) + b
            outs.append(s)
        pieces.append(jnp.max(jnp.stack(outs, axis=1), axis=1))
    return jnp.concatenate(pieces, axis=1)


if __name__ == "__main__":
    key = jax.random.PRNGKey(0)
    keys = jax.random.split(key, 3 + 2 * len(KERNEL_SIZES))
    k_sp, k_len, k_ce = keys[0], keys[1], keys[2]
    k_conv = keys[3:]

    # --- build the `spelling` tensor the module consumes: (V, MAX_LEN + 2) ---
    #     columns: [char_0 ... char_{L-1}, length, count]
    lengths = jax.random.randint(k_len, (V_SIZE,), 3, MAX_LEN + 1)
    chars = jax.random.randint(k_sp, (V_SIZE, MAX_LEN), 1, CV_SIZE)
    pos = jnp.arange(MAX_LEN)[None, :]
    chars = jnp.where(pos < lengths[:, None], chars, CP_IDX)
    counts = jnp.arange(1, V_SIZE + 1)
    spelling = jnp.concatenate(
        [chars, lengths[:, None], counts[:, None]], axis=1).astype(jnp.int32)

    # --- init_word2spelling (sort words by length, descending) ---------------
    lens = spelling[:, -2]
    spellings = spelling[:, :-2]
    sort_idx = jnp.argsort(-lens)                 # descending
    sorted_spellings = spellings[sort_idx, :]
    unsort_idx = jnp.argsort(sort_idx)            # == get_unsort_idx(sort_idx)

    # --- deterministic parameter init ----------------------------------------
    # ce_layer.weight ~ U(-0.5/ce, 0.5/ce); the PyTorch module overwrites the
    # Embedding weight, so the padding row is NOT zeroed.
    ce_weight = jax.random.uniform(
        k_ce, (CV_SIZE, CE_SIZE), jnp.float32, -0.5 / CE_SIZE, 0.5 / CE_SIZE)

    conv_ws, conv_bs = [], []
    for i, k in enumerate(KERNEL_SIZES):
        bound = 1.0 / float(CE_SIZE * k) ** 0.5   # PyTorch Conv1d default bound
        w = jax.random.uniform(k_conv[2 * i], (k, CE_SIZE, WE4),
                               jnp.float32, -bound, bound)
        b = jax.random.uniform(k_conv[2 * i + 1], (1, WE4),
                               jnp.float32, -bound, bound)
        # Round-trip weights through bf16 so kernel (bf16 MXU operands) and the
        # f32 reference consume identically-quantized values.
        conv_ws.append(w.astype(jnp.bfloat16).astype(jnp.float32))
        conv_bs.append(b)

    # --- host-side operand prep (layout plumbing, not compute) ---------------
    emb = ce_weight[sorted_spellings]                         # (V, L, CE) gather
    emb_bf = emb.astype(jnp.bfloat16)
    emb_flat = emb_bf.reshape(V_SIZE, MAX_LEN * CE_SIZE)      # lane-dense (V,128)

    w_big = build_fused_weight(conv_ws, MAX_LEN, CE_SIZE, WE4, PAD_W, R_MAX)
    w_big_bf = w_big.astype(jnp.bfloat16)                     # exact: already bf16
    bias_pad = build_fused_bias(conv_bs, WE4, PAD_W)

    # --- forward --------------------------------------------------------------
    composed_pad = cnn_representer_pallas(emb_flat, w_big_bf, bias_pad)  # (V,128)
    composed = composed_pad[:, :WE_SIZE]                      # drop lane padding
    unsorted_word_embeddings = composed[unsort_idx, :]        # final output
    unsorted_word_embeddings = jax.block_until_ready(unsorted_word_embeddings)

    # --- correctness check vs pure-JAX reference ------------------------------
    ref = _reference_cnn(emb_bf.astype(jnp.float32), conv_ws, conv_bs)[unsort_idx, :]
    assert unsorted_word_embeddings.shape == (V_SIZE, WE_SIZE)
    assert jnp.allclose(unsorted_word_embeddings, ref, atol=1e-4, rtol=1e-4)

    print("KERNEL_OK")
</pallas_src>

<mosaic_0001>
module attributes {stable_mosaic.version = 11 : i64} {
  func.func @_cnn_maxpool_kernel(%arg0: i32, %arg1: memref<128x128xbf16, #tpu.memory_space<vmem>>, %arg2: memref<128x768xbf16, #tpu.memory_space<vmem>>, %arg3: memref<1x128xf32, #tpu.memory_space<vmem>>, %arg4: memref<128x128xf32, #tpu.memory_space<vmem>>) attributes {dimension_semantics = [#tpu.dimension_semantics<parallel>], iteration_bounds = array<i64: 4>, scalar_prefetch = 0 : i64, scratch_operands = 0 : i64, tpu.core_type = #tpu.core_type<tc>, window_params = [{transform_indices = @transform_0, window_bounds = array<i64: 128, 128>}, {pipeline_mode = #tpu.pipeline_mode<synchronous>, transform_indices = @transform_1, window_bounds = array<i64: 128, 768>}, {pipeline_mode = #tpu.pipeline_mode<synchronous>, transform_indices = @transform_2, window_bounds = array<i64: 1, 128>}, {transform_indices = @transform_3, window_bounds = array<i64: 128, 128>}]} {
    %c0 = arith.constant 0 : index
    %c0_0 = arith.constant 0 : index
    %0 = vector.load %arg1[%c0, %c0_0] : memref<128x128xbf16, #tpu.memory_space<vmem>>, vector<128x128xbf16>
    %c0_1 = arith.constant 0 : index
    %c0_2 = arith.constant 0 : index
    %1 = vector.load %arg2[%c0_1, %c0_2] : memref<128x768xbf16, #tpu.memory_space<vmem>>, vector<128x768xbf16>
    %cst = arith.constant dense<0.000000e+00> : vector<128x768xf32>
    %2 = tpu.matmul %0, %1, %cst {dimension_numbers = #tpu.dot_dimension_numbers<[1], [0], [0], [1], [0, 0, 1, 1], [], []>} : vector<128x128xbf16>, vector<128x768xbf16>, vector<128x768xf32> -> vector<128x768xf32>
    %3 = vector.extract_strided_slice %2 {offsets = [0, 0], sizes = [128, 128], strides = [1, 1]} : vector<128x768xf32> to vector<128x128xf32>
    %4 = vector.extract_strided_slice %2 {offsets = [0, 128], sizes = [128, 128], strides = [1, 1]} : vector<128x768xf32> to vector<128x128xf32>
    %5 = arith.maximumf %3, %4 : vector<128x128xf32>
    %6 = vector.extract_strided_slice %2 {offsets = [0, 256], sizes = [128, 128], strides = [1, 1]} : vector<128x768xf32> to vector<128x128xf32>
    %7 = arith.maximumf %5, %6 : vector<128x128xf32>
    %8 = vector.extract_strided_slice %2 {offsets = [0, 384], sizes = [128, 128], strides = [1, 1]} : vector<128x768xf32> to vector<128x128xf32>
    %9 = arith.maximumf %7, %8 : vector<128x128xf32>
    %10 = vector.extract_strided_slice %2 {offsets = [0, 512], sizes = [128, 128], strides = [1, 1]} : vector<128x768xf32> to vector<128x128xf32>
    %11 = arith.maximumf %9, %10 : vector<128x128xf32>
    %12 = vector.extract_strided_slice %2 {offsets = [0, 640], sizes = [128, 128], strides = [1, 1]} : vector<128x768xf32> to vector<128x128xf32>
    %13 = arith.maximumf %11, %12 : vector<128x128xf32>
    %c0_3 = arith.constant 0 : index
    %c0_4 = arith.constant 0 : index
    %14 = vector.load %arg3[%c0_3, %c0_4] : memref<1x128xf32, #tpu.memory_space<vmem>>, vector<1x128xf32>
    %15 = vector.broadcast %14 : vector<1x128xf32> to vector<128x128xf32>
    %16 = arith.addf %13, %15 : vector<128x128xf32>
    %c0_5 = arith.constant 0 : index
    %c0_6 = arith.constant 0 : index
    %17 = vector.load %arg4[%c0_5, %c0_6] : memref<128x128xf32, #tpu.memory_space<vmem>>, vector<128x128xf32>
    tpu.vector_store %arg4[%c0_5, %c0_6], %16 {strides = array<i32>} : memref<128x128xf32, #tpu.memory_space<vmem>>, vector<128x128xf32>,
    return
  }
  func.func @transform_0(%arg0: i32) -> (i32, i32) {
    %c0_i32 = arith.constant 0 : i32
    %c0_i32_0 = arith.constant 0 : i32
    return %arg0, %c0_i32 : i32, i32
  }
  func.func @transform_1(%arg0: i32) -> (i32, i32) {
    %c0_i32 = arith.constant 0 : i32
    %c0_i32_0 = arith.constant 0 : i32
    %c0_i32_1 = arith.constant 0 : i32
    return %c0_i32, %c0_i32_0 : i32, i32
  }
  func.func @transform_2(%arg0: i32) -> (i32, i32) {
    %c0_i32 = arith.constant 0 : i32
    %c0_i32_0 = arith.constant 0 : i32
    %c0_i32_1 = arith.constant 0 : i32
    return %c0_i32, %c0_i32_0 : i32, i32
  }
  func.func @transform_3(%arg0: i32) -> (i32, i32) {
    %c0_i32 = arith.constant 0 : i32
    %c0_i32_0 = arith.constant 0 : i32
    return %arg0, %c0_i32 : i32, i32
  }
}

</mosaic_0001>

<bundles_post_ra>
// kernel: tpu_custom_call.1
= control target key start
LH: loop header
LB: loop body
LE: loop exit
PB: predicated region body
PF: predicated region fallthrough
CT: control target
= control target key end

     0   :  { %8 = vsyncpa [#allocation3], 0  ;;  %s1906_s0 = inlined_call_operand.hbm [shape: bf16[512,128], index: 0, kind: input, shape index: {}]   ;;  %s1907_s1 = inlined_call_operand.hbm [shape: bf16[128,768], index: 1, kind: input, shape index: {}]   ;;  %s1908_s2 = inlined_call_operand.vmem [shape: f32[1,128], index: 2, kind: input, shape index: {}]   ;;  %s1909_s3 = inlined_call_operand.hbm [shape: f32[512,128], index: 3, kind: output, shape index: {}]  }
   0x1   :  { %10 = vsyncpa [#allocation3 + $0x1], 0 }
   0x2   :  { %11 = vsyncpa [#allocation6], 0 }
   0x3   :  { %12 = vsyncpa [#allocation4], 0 }
   0x4   :  { %14 = vsyncpa [#allocation4 + $0x1], 0  ;;  %s1509_s12 = smov 0   ;;  %s1511_s13 = smov 0  }
   0x5   :  { %s1513_s14 = smov 0   ;;  %s1515_s15 = smov 0  }
   0x6 LB: > { %s1530_s16 = sadd.s32 4294967295, %s1477_s15   ;;  %s1114_s17 = sadd.s32 4294967294, %s1477_s15   ;;  %s1477_s15 = sphi %s1515_s15, %s1928_s15   ;;  %s1473_s14 = sphi %s1513_s14, %s1927_s14   ;;  %s1469_s13 = sphi %s1511_s13, %s1926_s13   ;;  %s1465_s12 = sphi %s1509_s12, %s1925_s12  }
   0x7   : > { %p40_p0 = scmp.ne.s32.totalorder %s1469_s13, %s1465_s12  ;;  %p1910_p1 = scmp.eq.s32.totalorder %s1530_s16, 0 }
   0x8   : > { %p112_p3 = scmp.eq.s32.totalorder %s1114_s17, 3  ;;  %p1115_p5 = scmp.ge.s32.totalorder %s1477_s15, 1 }
   0x9   : > { %p1539_p4 = por %p1910_p1, %p40_p0  ;;  %p119_p7 = scmp.lt.s32.totalorder %s1477_s15, 5 }
   0xa   : > { %p1544_p6 = por %p112_p3, %p40_p0  ;;  %s1479_s21 = smov [#allocation5]  }
   0xb   : > { %s1913_s18 = scalar_select %p1539_p4, 1, 0 }
   0xc   : > { %s1914_s19 = scalar_select %p1544_p6, 1, 0 }
   0xd   : > { %p1549_p8 = pnand %p1115_p5, %p119_p7  ;;  %s131_s22 = sshll.u32 %s1479_s21, 4  ;;  %s132_s22 = int_to_ptr.vmem [resolvable:$true] %s131_s22 }
   0xe   : > { %s1562_s24 = sadd.s32 1, %s1477_s15   ;;  %s27_s25 = sadd.s32 1, %s1473_s14 }
   0xf   : > { %s1915_s20 = scalar_select %p1549_p8, 1, 0 }
  0x10   : > { %p1213_p9 = pneg %p1549_p8  ;;  %s24_s26 = ssub.s32 %s1477_s15, %s1562_s24 }
  0x11   : > { %s1349_s29 = scalar_lea.hbm %s1907_s1, 6144 }
  0x12   : > { %p1557_p10 = pnand %p1213_p9, %p1910_p1  ;;  %p1350_p11 = scmp.ne.s32.totalorder %s1907_s1, %s1349_s29 }
  0x13   : > { %p1356_p3 = scmp.lt.u32.totalorder %s1349_s29, %s1907_s1 }
  0x14   : > { %p1351_p12 = pneg %p1557_p10 }
  0x16   : > { %p1352_p13 = pnand %p1351_p12, %p1350_p11 }
  0x18   : > { %p1353_p0 = pneg %p1352_p13 }
  0x1a   : > { %p1358_p5 = pnand %p1356_p3, %p1353_p0 }
  0x1c   : > { %1361 = shalt.err (!%p1358_p5)
}
  0x1d   : > { %s1362_s7 = scalar_lea.vmem %s132_s22, 6144  ;;  %p1370_p2 = scmp.lt.s32.totalorder %s132_s22, %s132_s22 }
  0x1e   : > { %p1363_p7 = scmp.ne.s32.totalorder %s132_s22, %s1362_s7  ;;  %p1371_p6 = scmp.lt.s32.totalorder %s1362_s7, %s1362_s7 }
  0x20   : > { %p1365_p9 = pnand %p1363_p7, %p1351_p12  ;;  %p1372_p4 = por %p1371_p6, %p1370_p2 }
  0x22   : > { %p1366_p1 = pneg %p1365_p9 }
  0x24   : > { %p1373_p8 = pnand %p1372_p4, %p1366_p1 }
  0x26   : > { %1376 = shalt.err (!%p1373_p8)
}
  0x27   : > { %s1480_s8 = smov 384   ;;  %s1481_s9 = smov 24  }
  0x28   : > { %1216 = dma.hbm_to_vmem [thread:$0]  (!%p1557_p10), %s1907_s1, 6144, %s132_s22, [#allocation6], %s1480_s8, %s1480_s8, %s1481_s9  }
  0x29   : > { %p25_p11 = scmp.eq.s32.totalorder %s24_s26, 0  ;;  %p34_p2 = scmp.ne.s32.totalorder %s1473_s14, %s1469_s13 }
  0x2a   : > { %p35_p1 = scmp.eq.s32.totalorder %s1477_s15, 0  ;;  %p1226_p4 = scmp.lt.s32.totalorder %s1477_s15, 4 }
  0x2b   : > { %s1588_s17 = scalar_select %p25_p11, %s1473_s14, %s27_s25  }
  0x2c   : > { %p36_p6 = por %p35_p1, %p34_p2  ;;  %p1917_p8 = scmp.eq.s32.totalorder %s1530_s16, 3 }
  0x2d   : > { %s148_s27 = sand.u32 1, %s1473_s14   ;;  %s1187_s28 = sshll.u32 %s1477_s15, 10 }
  0x2e   : > { %p1592_p12 = por %p1917_p8, %p34_p2  ;;  %s1118_s29 = sshll.u32 %s148_s27, 6 }
  0x2f   : > { %s1601_s4 = scalar_lea.hbm %s1906_s0, %s1187_s28  ;;  %s152_s22 = scalar_lea.vmem [#allocation2], %s1118_s29 }
  0x30   : > { %s159_s25 = sshll.u32 %s152_s22, 4  ;;  %p1603_p10 = pnand %p1226_p4, %p36_p6  ;;  %s1607_s25 = int_to_ptr.vmem [resolvable:$true] %s159_s25 }
  0x31   : > { %s1609_s5 = scalar_lea.sflag [#allocation3], %s148_s27  ;;  %s1377_s6 = scalar_lea.hbm %s1601_s4, 1024 }
  0x32   : > { %p1378_p13 = scmp.ne.s32.totalorder %s1601_s4, %s1377_s6  ;;  %p1379_p0 = pneg %p1603_p10 }
  0x33   : > { %s1382_s9 = scalar_lea.hbm %s1906_s0, 4096  ;;  %p1383_p7 = scmp.lt.u32.totalorder %s1601_s4, %s1906_s0 }
  0x34   : > { %p1380_p3 = pnand %p1379_p0, %p1378_p13  ;;  %p1384_p9 = scmp.lt.u32.totalorder %s1382_s9, %s1377_s6 }
  0x35   : > { %p1386_p2 = scmp.lt.u32.totalorder %s1377_s6, %s1601_s4 }
  0x36   : > { %p1381_p5 = pneg %p1380_p3  ;;  %p1385_p11 = por %p1384_p9, %p1383_p7 }
  0x38   : > { %p1387_p1 = por %p1386_p2, %p1385_p11 }
  0x3a   : > { %p1388_p4 = pnand %p1387_p1, %p1381_p5 }
  0x3c   : > { %1391 = shalt.err (!%p1388_p4)
}
  0x3d   : > { %s1392_s27 = scalar_lea.vmem %s1607_s25, 1024  ;;  %s1482_s28 = smov [#allocation2]  }
  0x3e   : > { %p1393_p6 = scmp.ne.s32.totalorder %s1607_s25, %s1392_s27  ;;  %s1397_s29 = sshll.u32 %s1482_s28, 4  ;;  %s1398_s29 = int_to_ptr.vmem [resolvable:$false] %s1397_s29 }
  0x3f   : > { %s1399_s23 = scalar_lea.vmem %s1398_s29, 2048  ;;  %p1400_p3 = scmp.lt.s32.totalorder %s1607_s25, %s1398_s29 }
  0x40   : > { %p1395_p8 = pnand %p1393_p6, %p1379_p0  ;;  %p1401_p7 = scmp.lt.s32.totalorder %s1399_s23, %s1392_s27 }
  0x42   : > { %p1396_p13 = pneg %p1395_p8  ;;  %p1402_p9 = por %p1401_p7, %p1400_p3 }
  0x44   : > { %p1403_p11 = pnand %p1402_p9, %p1396_p13 }
  0x46   : > { %1406 = shalt.err (!%p1403_p11)
}
  0x47   : > { %s1483_s30 = smov 64   ;;  %s1484_s22 = smov 4  }
  0x48   : > { %1220 = dma.hbm_to_vmem [thread:$0]  (!%p1603_p10), %s1601_s4, 1024, %s1607_s25, %s1609_s5, %s1483_s30, %s1483_s30, %s1484_s22  }
  0x49   : > { %p1920_p0 = scmp.ne.s32.totalorder %s1915_s20, 0 }
  0x4a   : > { %s1640_s6 = sand.u32 (!%p1920_p0), 1, %s1469_s13   ;;  %p1921_p5 = scmp.ne.s32.totalorder (!%p1920_p0), %s1913_s18, 0 }
  0x4b   : > { %171 = sbr.rel (%p1920_p0) target bundleno = 447 (0x1bf), region = 32  ;;  %s1122_s7 = sshll.u32 (!%p1920_p0), %s1640_s6, 6 }
  0x4c   : > { %s174_s8 = scalar_lea.sflag (!%p1920_p0), [#allocation3], %s1640_s6  ;;  %s1644_s9 = scalar_lea.vmem (!%p1920_p0), [#allocation2], %s1122_s7 }
  0x52   : > { %1452 = dma.done.wait (%p1921_p5), %s174_s8, 1024  }
  0x53   : > { %1454 = vsyncadd (%p1921_p5), %s174_s8, 4294966272  ;;  %p1922_p10 = scmp.eq.s32.totalorder %s1530_s16, 0 }
  0x55   : > { %1456 = dma.done.wait (%p1922_p10), [#allocation6], 6144   ;;  %p1923_p2 = pmov %p1922_p10 }
  0x56   : > { %v1485_v0 = vmov 0   ;;  %v1269_v1 = vld [vmem:[#allocation5 + $0x4] ss:$24 sps:$4 sm:$0xff]   ;;  %v1271_v2 = vld [vmem:[#allocation5] ss:$24 sps:$4 sm:$0xff]   ;;  %v1667_v29 = vld [vmem:[%s1644_s9 + $0x28] sm:$0xff]  }
  0x57   : > { %1458 = vsyncadd (%p1923_p2), [#allocation6], 4294961152  ;;  %631 = vmatprep.mubr.bf16.mxu1 %v1485_v0  ;;  %591 = vmatprep.mubr.bf16.mxu0 %v1485_v0  ;;  %v1272_v3 = vld [vmem:[#allocation5 + $0x34] ss:$24 sps:$4 sm:$0xff]   ;;  %v1274_v4 = vld [vmem:[#allocation5 + $0x30] ss:$24 sps:$4 sm:$0xff]  }
  0x58   : > { %1189 = vmatprep.subr.bf16.mxu1 %v1269_v1  ;;  %559 = vmatprep.subr.bf16.mxu0 %v1269_v1  ;;  %v1275_v5 = vld [vmem:[#allocation5 + $0x64] ss:$24 sps:$4 sm:$0xff]   ;;  %v1277_v6 = vld [vmem:[#allocation5 + $0x60] ss:$24 sps:$4 sm:$0xff]   ;;  %v1278_v7 = vld [vmem:[#allocation5 + $0x94] ss:$24 sps:$4 sm:$0xff]  }
  0x59   : > { %1197 = vmatpush1.bf16.msra.mxu1 %v1271_v2  ;;  %560 = vmatpush1.bf16.msra.mxu0 %v1271_v2  ;;  %v1280_v8 = vld [vmem:[#allocation5 + $0x90] ss:$24 sps:$4 sm:$0xff]   ;;  %v1281_v9 = vld [vmem:[#allocation5 + $0xc4] ss:$24 sps:$4 sm:$0xff]   ;;  %v1283_v10 = vld [vmem:[#allocation5 + $0xc0] ss:$24 sps:$4 sm:$0xff]  }
  0x5a   : > { %1190 = vmatprep.subr.bf16.mxu1 %v1272_v3  ;;  %561 = vmatprep.subr.bf16.mxu0 %v1272_v3  ;;  %v1284_v11 = vld [vmem:[#allocation5 + $0xf4] ss:$24 sps:$4 sm:$0xff]   ;;  %v1286_v12 = vld [vmem:[#allocation5 + $0xf0] ss:$24 sps:$4 sm:$0xff]   ;;  %v1287_v13 = vld [vmem:[#allocation5 + $0x124] ss:$24 sps:$4 sm:$0xff]  }
  0x5b   : > { %v1289_v14 = vld [vmem:[#allocation5 + $0x120] ss:$24 sps:$4 sm:$0xff]   ;;  %v1290_v15 = vld [vmem:[#allocation5 + $0x154] ss:$24 sps:$4 sm:$0xff]   ;;  %v1292_v16 = vld [vmem:[#allocation5 + $0x150] ss:$24 sps:$4 sm:$0xff]  }
  0x5c   : > { %v1296_v17 = vld [vmem:[#allocation5 + $0xc] ss:$24 sps:$4 sm:$0xff]   ;;  %v1294_v20 = vld [vmem:[#allocation5 + $0x8] ss:$24 sps:$4 sm:$0xff]   ;;  %v1303_v23 = vld [vmem:[#allocation5 + $0x3c] ss:$24 sps:$4 sm:$0xff]  }
  0x5d   : > { %1198 = vmatpush1.bf16.msra.mxu1 %v1274_v4  ;;  %562 = vmatpush1.bf16.msra.mxu0 %v1274_v4  ;;  %v1300_v18 = vld [vmem:[#allocation5 + $0x14] ss:$24 sps:$4 sm:$0xff]   ;;  %v1657_v19 = vld [vmem:[%s1644_s9 + $0x20] sm:$0xff]   ;;  %v1298_v22 = vld [vmem:[#allocation5 + $0x10] ss:$24 sps:$4 sm:$0xff]   ;;  %s1124_s18 = sshll.u32 %s1640_s6, 7 }
  0x5e   : > { %1191 = vmatprep.subr.bf16.mxu1 %v1275_v5  ;;  %563 = vmatprep.subr.bf16.mxu0 %v1275_v5  ;;  %v1660_v21 = vld [vmem:[%s1644_s9] sm:$0xff]   ;;  %v1301_v25 = vld [vmem:[#allocation5 + $0x38] ss:$24 sps:$4 sm:$0xff]   ;;  %v1314_v28 = vld [vmem:[#allocation5 + $0x74] ss:$24 sps:$4 sm:$0xff]   ;;  %s1790_s25 = scalar_lea.vmem [#allocation7], %s1124_s18 }
  0x5f   : > { %v1306_v24 = vld [vmem:[#allocation5 + $0x44] ss:$24 sps:$4 sm:$0xff]   ;;  %v1304_v26 = vld [vmem:[#allocation5 + $0x40] ss:$24 sps:$4 sm:$0xff]   ;;  %v1670_v30 = vld [vmem:[%s1644_s9 + $0x8] sm:$0xff]   ;;  %s1188_s26 = sshll.u32 %s1530_s16, 11 }
  0x60   : > { %v1310_v27 = vld [vmem:[#allocation5 + $0x6c] ss:$24 sps:$4 sm:$0xff]   ;;  %v1308_v31 = vld [vmem:[#allocation5 + $0x68] ss:$24 sps:$4 sm:$0xff]   ;;  %v1317_v33 = vld [vmem:[#allocation5 + $0x9c] ss:$24 sps:$4 sm:$0xff]   ;;  %s1858_s27 = scalar_lea.hbm %s1909_s3, %s1188_s26 }
  0x61   : > { %1199 = vmatpush1.bf16.msra.mxu1 %v1277_v6  ;;  %564 = vmatpush1.bf16.msra.mxu0 %v1277_v6  ;;  %v1312_v32 = vld [vmem:[#allocation5 + $0x70] ss:$24 sps:$4 sm:$0xff]   ;;  %v1320_v34 = vld [vmem:[#allocation5 + $0xa4] ss:$24 sps:$4 sm:$0xff]   ;;  %v1318_v36 = vld [vmem:[#allocation5 + $0xa0] ss:$24 sps:$4 sm:$0xff]  }
  0x62   : > { %1192 = vmatprep.subr.bf16.mxu1 %v1278_v7  ;;  %565 = vmatprep.subr.bf16.mxu0 %v1278_v7  ;;  %v1315_v35 = vld [vmem:[#allocation5 + $0x98] ss:$24 sps:$4 sm:$0xff]   ;;  %v1324_v37 = vld [vmem:[#allocation5 + $0xcc] ss:$24 sps:$4 sm:$0xff]   ;;  %v1322_v41 = vld [vmem:[#allocation5 + $0xc8] ss:$24 sps:$4 sm:$0xff]  }
  0x63   : > { %v1328_v38 = vld [vmem:[#allocation5 + $0xd4] ss:$24 sps:$4 sm:$0xff]   ;;  %v1326_v42 = vld [vmem:[#allocation5 + $0xd0] ss:$24 sps:$4 sm:$0xff]   ;;  %v1334_v44 = vld [vmem:[#allocation5 + $0x104] ss:$24 sps:$4 sm:$0xff]  }
  0x64   : > { %v1677_v39 = vld [vmem:[%s1644_s9 + $0x30] sm:$0xff]   ;;  %v1332_v46 = vld [vmem:[#allocation5 + $0x100] ss:$24 sps:$4 sm:$0xff]   ;;  %v1338_v47 = vld [vmem:[#allocation5 + $0x12c] ss:$24 sps:$4 sm:$0xff]   ;;  %s1031_s5 = sshll.u32 %s1790_s25, 4  ;;  %s1860_s5 = int_to_ptr.vmem [resolvable:$true] %s1031_s5 }
  0x65   : > { %1200 = vmatpush1.bf16.msra.mxu1 %v1280_v8  ;;  %566 = vmatpush1.bf16.msra.mxu0 %v1280_v8  ;;  %v1325_v40 = vld [vmem:[%s1644_s9 + $0x10] sm:$0xff]   ;;  %v1335_v49 = vld [vmem:[%s1644_s9 + $0x38] sm:$0xff]   ;;  %v1336_v51 = vld [vmem:[#allocation5 + $0x128] ss:$24 sps:$4 sm:$0xff]   ;;  %s1018_s28 = scalar_lea.sflag [#allocation4], %s1640_s6  ;;  %s1407_s16 = scalar_lea.vmem %s1860_s5, 2048 }
  0x66   : > { %1193 = vmatprep.subr.bf16.mxu1 %v1281_v9  ;;  %567 = vmatprep.subr.bf16.mxu0 %v1281_v9  ;;  %v1331_v43 = vld [vmem:[#allocation5 + $0xfc] ss:$24 sps:$4 sm:$0xff]   ;;  %v1329_v45 = vld [vmem:[#allocation5 + $0xf8] ss:$24 sps:$4 sm:$0xff]   ;;  %p1408_p1 = scmp.ne.s32.totalorder %s1860_s5, %s1407_s16  ;;  %s1486_s29 = smov [#allocation7]  }
  0x67   : > { %v1342_v48 = vld [vmem:[#allocation5 + $0x134] ss:$24 sps:$4 sm:$0xff]   ;;  %v1339_v50 = vld [vmem:[%s1644_s9 + $0x18] sm:$0xff]   ;;  %v1340_v52 = vld [vmem:[#allocation5 + $0x130] ss:$24 sps:$4 sm:$0xff]   ;;  %s1411_s23 = sshll.u32 %s1486_s29, 4  ;;  %s1412_s23 = int_to_ptr.vmem [resolvable:$false] %s1411_s23 }
  0x68   : > { %v1345_v53 = vld [vmem:[#allocation5 + $0x15c] ss:$24 sps:$4 sm:$0xff]   ;;  %v1343_v55 = vld [vmem:[#allocation5 + $0x158] ss:$24 sps:$4 sm:$0xff]   ;;  %p1409_p4 = pnand %p1408_p1, %p1592_p12  ;;  %s1413_s30 = scalar_lea.vmem %s1412_s23, 4096 }
  0x69   : > { %1201 = vmatpush1.bf16.msra.mxu1 %v1283_v10  ;;  %568 = vmatpush1.bf16.msra.mxu0 %v1283_v10  ;;  %v1348_v54 = vld [vmem:[#allocation5 + $0x164] ss:$24 sps:$4 sm:$0xff]   ;;  %v1346_v56 = vld [vmem:[#allocation5 + $0x160] ss:$24 sps:$4 sm:$0xff]   ;;  %p1414_p8 = scmp.lt.s32.totalorder %s1860_s5, %s1412_s23  ;;  %p1415_p13 = scmp.lt.s32.totalorder %s1413_s30, %s1407_s16 }
  0x6a   : > { %1194 = vmatprep.subr.bf16.mxu1 %v1284_v11  ;;  %569 = vmatprep.subr.bf16.mxu0 %v1284_v11  ;;  %p1410_p6 = pneg %p1409_p4 }
  0x6b   : > { %p1416_p3 = por %p1415_p13, %p1414_p8 }
  0x6d   : > { %1202 = vmatpush1.bf16.msra.mxu1 %v1286_v12  ;;  %570 = vmatpush1.bf16.msra.mxu0 %v1286_v12  ;;  %p1417_p7 = pnand %p1416_p3, %p1410_p6 }
  0x6e   : > { %1195 = vmatprep.subr.bf16.mxu1 %v1287_v13  ;;  %571 = vmatprep.subr.bf16.mxu0 %v1287_v13 }
  0x71   : > { %1203 = vmatpush1.bf16.msra.mxu1 %v1289_v14  ;;  %572 = vmatpush1.bf16.msra.mxu0 %v1289_v14 }
  0x72   : > { %1196 = vmatprep.subr.bf16.mxu1 %v1290_v15  ;;  %573 = vmatprep.subr.bf16.mxu0 %v1290_v15 }
  0x75   : > { %1204 = vmatpush1.bf16.msra.mxu1 %v1292_v16  ;;  %574 = vmatpush1.bf16.msra.mxu0 %v1292_v16 }
  0x76   : > { %672 = vmatprep.subr.bf16.mxu1 %v1296_v17  ;;  %785 = vmatprep.subr.bf16.mxu0 %v1300_v18 }
  0x78   : > { %632 = vmatmul.mubr.bf16.vlgmr.msra.gmra.mrb[0].mxu1 %v1657_v19  ;;  %592 = vmatmul.mubr.bf16.vlgmr.msra.gmra.mrb[0].mxu0 %v1660_v21 }
  0x79   : > { %673 = vmatpush1.bf16.msra.mxu1 %v1294_v20  ;;  %786 = vmatpush1.bf16.msra.mxu0 %v1298_v22 }
  0x7a   : > { %674 = vmatprep.subr.bf16.mxu1 %v1303_v23  ;;  %787 = vmatprep.subr.bf16.mxu0 %v1306_v24 }
  0x7b   : > { %641 = vmatprep.mubr.bf16.mxu1 %v1485_v0  ;;  %601 = vmatprep.mubr.bf16.mxu0 %v1485_v0 }
  0x7d   : > { %675 = vmatpush1.bf16.msra.mxu1 %v1301_v25  ;;  %788 = vmatpush1.bf16.msra.mxu0 %v1304_v26 }
  0x7e   : > { %676 = vmatprep.subr.bf16.mxu1 %v1310_v27  ;;  %789 = vmatprep.subr.bf16.mxu0 %v1314_v28 }
  0x80   : > { %642 = vmatmul.mubr.bf16.gmra.mrb[4].mxu1 %v1667_v29  ;;  %602 = vmatmul.mubr.bf16.gmra.mrb[4].mxu0 %v1670_v30 }
  0x81   : > { %677 = vmatpush1.bf16.msra.mxu1 %v1308_v31  ;;  %790 = vmatpush1.bf16.msra.mxu0 %v1312_v32 }
  0x82   : > { %678 = vmatprep.subr.bf16.mxu1 %v1317_v33  ;;  %791 = vmatprep.subr.bf16.mxu0 %v1320_v34 }
  0x83   : > { %651 = vmatprep.mubr.bf16.mxu1 %v1485_v0  ;;  %611 = vmatprep.mubr.bf16.mxu0 %v1485_v0 }
  0x85   : > { %679 = vmatpush1.bf16.msra.mxu1 %v1315_v35  ;;  %792 = vmatpush1.bf16.msra.mxu0 %v1318_v36 }
  0x86   : > { %680 = vmatprep.subr.bf16.mxu1 %v1324_v37  ;;  %793 = vmatprep.subr.bf16.mxu0 %v1328_v38 }
  0x88   : > { %652 = vmatmul.mubr.bf16.gmra.mrb[8].mxu1 %v1677_v39  ;;  %612 = vmatmul.mubr.bf16.gmra.mrb[8].mxu0 %v1325_v40 }
  0x89   : > { %681 = vmatpush1.bf16.msra.mxu1 %v1322_v41  ;;  %794 = vmatpush1.bf16.msra.mxu0 %v1326_v42 }
  0x8a   : > { %682 = vmatprep.subr.bf16.mxu1 %v1331_v43  ;;  %795 = vmatprep.subr.bf16.mxu0 %v1334_v44 }
  0x8b   : > { %661 = vmatprep.mubr.bf16.mxu1 %v1485_v0  ;;  %621 = vmatprep.mubr.bf16.mxu0 %v1485_v0 }
  0x8d   : > { %683 = vmatpush1.bf16.msra.mxu1 %v1329_v45  ;;  %796 = vmatpush1.bf16.msra.mxu0 %v1332_v46 }
  0x8e   : > { %684 = vmatprep.subr.bf16.mxu1 %v1338_v47  ;;  %797 = vmatprep.subr.bf16.mxu0 %v1342_v48 }
  0x90   : > { %662 = vmatmul.mubr.bf16.gmra.mrb[12].mxu1 %v1335_v49  ;;  %622 = vmatmul.mubr.bf16.gmra.mrb[12].mxu0 %v1339_v50 }
  0x91   : > { %685 = vmatpush1.bf16.msra.mxu1 %v1336_v51  ;;  %798 = vmatpush1.bf16.msra.mxu0 %v1340_v52 }
  0x92   : > { %686 = vmatprep.subr.bf16.mxu1 %v1345_v53  ;;  %799 = vmatprep.subr.bf16.mxu0 %v1348_v54  ;;  %v1787_v54 = vld [vmem:[%s1908_s2] ss:$0 sm:$0xff] }
  0x93   : > { %704 = vmatprep.mubr.bf16.mxu1 %v1485_v0  ;;  %817 = vmatprep.mubr.bf16.mxu0 %v1485_v0 }
  0x95   : > { %687 = vmatpush1.bf16.msra.mxu1 %v1343_v55  ;;  %800 = vmatpush1.bf16.msra.mxu0 %v1346_v56 }
  0x98   : > { %705 = vmatmul.mubr.bf16.vlgmr.msra.gmra.mrb[16].mxu1 %v1660_v21  ;;  %818 = vmatmul.mubr.bf16.vlgmr.msra.gmra.mrb[16].mxu0 %v1660_v21 }
  0x99   : > { %714 = vmatprep.mubr.bf16.mxu1 %v1485_v0  ;;  %827 = vmatprep.mubr.bf16.mxu0 %v1485_v0 }
  0xa0   : > { %715 = vmatmul.mubr.bf16.gmra.mrb[20].mxu1 %v1670_v30  ;;  %828 = vmatmul.mubr.bf16.gmra.mrb[20].mxu0 %v1670_v30 }
  0xa1   : > { %724 = vmatprep.mubr.bf16.mxu1 %v1485_v0  ;;  %837 = vmatprep.mubr.bf16.mxu0 %v1485_v0 }
  0xa8   : > { %725 = vmatmul.mubr.bf16.gmra.mrb[24].mxu1 %v1325_v40  ;;  %838 = vmatmul.mubr.bf16.gmra.mrb[24].mxu0 %v1325_v40 }
  0xa9   : > { %734 = vmatprep.mubr.bf16.mxu1 %v1485_v0  ;;  %847 = vmatprep.mubr.bf16.mxu0 %v1485_v0 }
  0xb0   : > { %735 = vmatmul.mubr.bf16.gmra.mrb[28].mxu1 %v1339_v50  ;;  %848 = vmatmul.mubr.bf16.gmra.mrb[28].mxu0 %v1339_v50 }
  0xb1   : > { %744 = vmatprep.mubr.bf16.mxu1 %v1485_v0  ;;  %857 = vmatprep.mubr.bf16.mxu0 %v1485_v0 }
  0xb8   : > { %745 = vmatmul.mubr.bf16.gmra.mrb[32].mxu1 %v1657_v19  ;;  %858 = vmatmul.mubr.bf16.gmra.mrb[32].mxu0 %v1657_v19 }
  0xb9   : > { %754 = vmatprep.mubr.bf16.mxu1 %v1485_v0  ;;  %867 = vmatprep.mubr.bf16.mxu0 %v1485_v0 }
  0xc0   : > { %755 = vmatmul.mubr.bf16.gmra.mrb[36].mxu1 %v1667_v29  ;;  %868 = vmatmul.mubr.bf16.gmra.mrb[36].mxu0 %v1667_v29 }
  0xc1   : > { %764 = vmatprep.mubr.bf16.mxu1 %v1485_v0  ;;  %877 = vmatprep.mubr.bf16.mxu0 %v1485_v0 }
  0xc8   : > { %765 = vmatmul.mubr.bf16.gmra.mrb[40].mxu1 %v1677_v39  ;;  %878 = vmatmul.mubr.bf16.gmra.mrb[40].mxu0 %v1677_v39 }
  0xc9   : > { %774 = vmatprep.mubr.bf16.mxu1 %v1485_v0  ;;  %887 = vmatprep.mubr.bf16.mxu0 %v1485_v0 }
  0xd0   : > { %775 = vmatmul.mubr.bf16.gmra.mrb[44].mxu1 %v1335_v49  ;;  %888 = vmatmul.mubr.bf16.gmra.mrb[44].mxu0 %v1335_v49 }
 0x14b   : > { %v1711_v57 = vpop.f32.mrb[0].mxu1  ;;  %v593_v58 = vpop.f32.mrb[0].mxu0 }
 0x14c   : > { %v1713_v59 = vpop.f32.mrb[1].mxu1  ;;  %v595_v60 = vpop.f32.mrb[1].mxu0 }
 0x14d   : > { %v906_v61 = vmax.f32 %v1711_v57, %v1713_v59  ;;  %v1717_v62 = vpop.f32.mrb[2].mxu1  ;;  %v898_v63 = vmax.f32 %v593_v58, %v595_v60  ;;  %v597_v1 = vpop.f32.mrb[2].mxu0 }
 0x14e   : > { %v1719_v2 = vpop.f32.mrb[3].mxu1  ;;  %v599_v3 = vpop.f32.mrb[3].mxu0 }
 0x14f   : > { %v907_v0 = vmax.f32 %v1717_v62, %v1719_v2  ;;  %v899_v4 = vmax.f32 %v597_v1, %v599_v3 }
 0x153   : > { %v1723_v5 = vpop.f32.mrb[4].mxu1  ;;  %v603_v6 = vpop.f32.mrb[4].mxu0 }
 0x154   : > { %v1725_v7 = vpop.f32.mrb[5].mxu1  ;;  %v605_v8 = vpop.f32.mrb[5].mxu0 }
 0x155   : > { %v908_v9 = vmax.f32 %v1723_v5, %v1725_v7  ;;  %v1729_v10 = vpop.f32.mrb[6].mxu1  ;;  %v900_v11 = vmax.f32 %v603_v6, %v605_v8  ;;  %v607_v12 = vpop.f32.mrb[6].mxu0 }
 0x156   : > { %v1731_v13 = vpop.f32.mrb[7].mxu1  ;;  %v609_v14 = vpop.f32.mrb[7].mxu0 }
 0x157   : > { %v909_v15 = vmax.f32 %v1729_v10, %v1731_v13  ;;  %v901_v16 = vmax.f32 %v607_v12, %v609_v14 }
 0x15b   : > { %v1735_v17 = vpop.f32.mrb[8].mxu1  ;;  %v1737_v18 = vpop.f32.mrb[8].mxu0 }
 0x15c   : > { %v1739_v19 = vpop.f32.mrb[9].mxu1  ;;  %v1741_v20 = vpop.f32.mrb[9].mxu0 }
 0x15d   : > { %v910_v21 = vmax.f32 %v1735_v17, %v1739_v19  ;;  %v1745_v22 = vpop.f32.mrb[10].mxu1  ;;  %v902_v23 = vmax.f32 %v1737_v18, %v1741_v20  ;;  %v1749_v24 = vpop.f32.mrb[10].mxu0 }
 0x15e   : > { %v1751_v25 = vpop.f32.mrb[11].mxu1  ;;  %v1753_v26 = vpop.f32.mrb[11].mxu0 }
 0x15f   : > { %v911_v27 = vmax.f32 %v1745_v22, %v1751_v25  ;;  %v903_v28 = vmax.f32 %v1749_v24, %v1753_v26 }
 0x163   : > { %v1759_v29 = vpop.f32.mrb[12].mxu1  ;;  %v1761_v30 = vpop.f32.mrb[12].mxu0 }
 0x164   : > { %v1763_v31 = vpop.f32.mrb[13].mxu1  ;;  %v1765_v32 = vpop.f32.mrb[13].mxu0 }
 0x165   : > { %v912_v33 = vmax.f32 %v1759_v29, %v1763_v31  ;;  %v1769_v34 = vpop.f32.mrb[14].mxu1  ;;  %v904_v35 = vmax.f32 %v1761_v30, %v1765_v32  ;;  %v1773_v36 = vpop.f32.mrb[14].mxu0 }
 0x166   : > { %v1775_v37 = vpop.f32.mrb[15].mxu1  ;;  %v1777_v38 = vpop.f32.mrb[15].mxu0 }
 0x167   : > { %v913_v39 = vmax.f32 %v1769_v34, %v1775_v37  ;;  %v905_v40 = vmax.f32 %v1773_v36, %v1777_v38 }
 0x16b   : > { %v706_v41 = vpop.f32.mrb[16].mxu1  ;;  %v819_v42 = vpop.f32.mrb[16].mxu0 }
 0x16c   : > { %v914_v43 = vmax.f32 %v898_v63, %v706_v41  ;;  %v708_v44 = vpop.f32.mrb[17].mxu1  ;;  %v821_v45 = vpop.f32.mrb[17].mxu0 }
 0x16d   : > { %v710_v46 = vpop.f32.mrb[18].mxu1  ;;  %v823_v47 = vpop.f32.mrb[18].mxu0 }
 0x16e   : > { %v930_v48 = vmax.f32 %v914_v43, %v708_v44  ;;  %v915_v49 = vmax.f32 %v899_v4, %v710_v46  ;;  %v712_v50 = vpop.f32.mrb[19].mxu1  ;;  %v825_v51 = vpop.f32.mrb[19].mxu0 }
 0x170   : > { %v946_v52 = vmax.f32 %v930_v48, %v819_v42  ;;  %v931_v53 = vmax.f32 %v915_v49, %v712_v50 }
 0x172   : > { %v962_v55 = vmax.f32 %v946_v52, %v821_v45  ;;  %v947_v56 = vmax.f32 %v931_v53, %v823_v47 }
 0x173   : > { %v716_v58 = vpop.f32.mrb[20].mxu1  ;;  %v829_v60 = vpop.f32.mrb[20].mxu0 }
 0x174   : > { %v985_v63 = vadd.f32 %v1787_v54, %v962_v55  ;;  %v963_v1 = vmax.f32 %v947_v56, %v825_v51  ;;  %v916_v3 = vmax.f32 %v900_v11, %v716_v58  ;;  %v718_v6 = vpop.f32.mrb[21].mxu1  ;;  %v831_v4 = vpop.f32.mrb[21].mxu0 }
 0x175   : > { %v720_v8 = vpop.f32.mrb[22].mxu1  ;;  %v833_v12 = vpop.f32.mrb[22].mxu0 }
 0x176   : > { %1001 = vst [vmem:[%s1790_s25] sm:$0xff] %v985_v63  ;;  %v986_v14 = vadd.f32 %v1787_v54, %v963_v1  ;;  %v932_v18 = vmax.f32 %v916_v3, %v718_v6  ;;  %v917_v20 = vmax.f32 %v901_v16, %v720_v8  ;;  %v722_v41 = vpop.f32.mrb[23].mxu1  ;;  %v835_v42 = vpop.f32.mrb[23].mxu0 }
 0x178   : > { %1002 = vst [vmem:[%s1790_s25 + $0x8] sm:$0xff] %v986_v14  ;;  %v948_v43 = vmax.f32 %v932_v18, %v829_v60  ;;  %v933_v44 = vmax.f32 %v917_v20, %v722_v41 }
 0x17a   : > { %v964_v11 = vmax.f32 %v948_v43, %v831_v4  ;;  %v949_v45 = vmax.f32 %v933_v44, %v833_v12 }
 0x17b   : > { %v726_v46 = vpop.f32.mrb[24].mxu1  ;;  %v839_v47 = vpop.f32.mrb[24].mxu0 }
 0x17c   : > { %v987_v48 = vadd.f32 %v1787_v54, %v964_v11  ;;  %v965_v49 = vmax.f32 %v949_v45, %v835_v42  ;;  %v918_v50 = vmax.f32 %v902_v23, %v726_v46  ;;  %v728_v51 = vpop.f32.mrb[25].mxu1  ;;  %v841_v52 = vpop.f32.mrb[25].mxu0 }
 0x17d   : > { %v730_v53 = vpop.f32.mrb[26].mxu1  ;;  %v843_v55 = vpop.f32.mrb[26].mxu0 }
 0x17e   : > { %1003 = vst [vmem:[%s1790_s25 + $0x10] sm:$0xff] %v987_v48  ;;  %v988_v16 = vadd.f32 %v1787_v54, %v965_v49  ;;  %v934_v56 = vmax.f32 %v918_v50, %v728_v51  ;;  %v919_v58 = vmax.f32 %v903_v28, %v730_v53  ;;  %v732_v60 = vpop.f32.mrb[27].mxu1  ;;  %v845_v63 = vpop.f32.mrb[27].mxu0 }
 0x180   : > { %1004 = vst [vmem:[%s1790_s25 + $0x18] sm:$0xff] %v988_v16  ;;  %v950_v1 = vmax.f32 %v934_v56, %v839_v47  ;;  %v935_v3 = vmax.f32 %v919_v58, %v732_v60 }
 0x182   : > { %v966_v6 = vmax.f32 %v950_v1, %v841_v52  ;;  %v951_v23 = vmax.f32 %v935_v3, %v843_v55 }
 0x183   : > { %v736_v4 = vpop.f32.mrb[28].mxu1  ;;  %v849_v8 = vpop.f32.mrb[28].mxu0 }
 0x184   : > { %v989_v12 = vadd.f32 %v1787_v54, %v966_v6  ;;  %v967_v14 = vmax.f32 %v951_v23, %v845_v63  ;;  %v920_v18 = vmax.f32 %v904_v35, %v736_v4  ;;  %v738_v24 = vpop.f32.mrb[29].mxu1  ;;  %v851_v26 = vpop.f32.mrb[29].mxu0 }
 0x185   : > { %v740_v28 = vpop.f32.mrb[30].mxu1  ;;  %v853_v20 = vpop.f32.mrb[30].mxu0 }
 0x186   : > { %1005 = vst [vmem:[%s1790_s25 + $0x20] sm:$0xff] %v989_v12  ;;  %v990_v41 = vadd.f32 %v1787_v54, %v967_v14  ;;  %v936_v42 = vmax.f32 %v920_v18, %v738_v24  ;;  %v921_v43 = vmax.f32 %v905_v40, %v740_v28  ;;  %v742_v44 = vpop.f32.mrb[31].mxu1  ;;  %v855_v11 = vpop.f32.mrb[31].mxu0 }
 0x188   : > { %1006 = vst [vmem:[%s1790_s25 + $0x28] sm:$0xff] %v990_v41  ;;  %v952_v45 = vmax.f32 %v936_v42, %v849_v8  ;;  %v937_v46 = vmax.f32 %v921_v43, %v742_v44 }
 0x18a   : > { %v968_v30 = vmax.f32 %v952_v45, %v851_v26  ;;  %v953_v32 = vmax.f32 %v937_v46, %v853_v20 }
 0x18b   : > { %v746_v35 = vpop.f32.mrb[32].mxu1  ;;  %v859_v47 = vpop.f32.mrb[32].mxu0 }
 0x18c   : > { %v991_v48 = vadd.f32 %v1787_v54, %v968_v30  ;;  %v969_v49 = vmax.f32 %v953_v32, %v855_v11  ;;  %v922_v50 = vmax.f32 %v906_v61, %v746_v35  ;;  %v748_v36 = vpop.f32.mrb[33].mxu1  ;;  %v861_v38 = vpop.f32.mrb[33].mxu0 }
 0x18d   : > { %v750_v40 = vpop.f32.mrb[34].mxu1  ;;  %v863_v51 = vpop.f32.mrb[34].mxu0 }
 0x18e   : > { %1007 = vst [vmem:[%s1790_s25 + $0x30] sm:$0xff] %v991_v48  ;;  %v992_v52 = vadd.f32 %v1787_v54, %v969_v49  ;;  %v938_v53 = vmax.f32 %v922_v50, %v748_v36  ;;  %v923_v55 = vmax.f32 %v907_v0, %v750_v40  ;;  %v752_v16 = vpop.f32.mrb[35].mxu1  ;;  %v865_v56 = vpop.f32.mrb[35].mxu0 }
 0x190   : > { %1008 = vst [vmem:[%s1790_s25 + $0x38] sm:$0xff] %v992_v52  ;;  %v954_v58 = vmax.f32 %v938_v53, %v859_v47  ;;  %v939_v60 = vmax.f32 %v923_v55, %v752_v16 }
 0x192   : > { %v970_v57 = vmax.f32 %v954_v58, %v861_v38  ;;  %v955_v59 = vmax.f32 %v939_v60, %v863_v51 }
 0x193   : > { %v756_v61 = vpop.f32.mrb[36].mxu1  ;;  %v869_v63 = vpop.f32.mrb[36].mxu0 }
 0x194   : > { %v993_v1 = vadd.f32 %v1787_v54, %v970_v57  ;;  %v971_v3 = vmax.f32 %v955_v59, %v865_v56  ;;  %v924_v6 = vmax.f32 %v908_v9, %v756_v61  ;;  %v758_v62 = vpop.f32.mrb[37].mxu1  ;;  %v871_v2 = vpop.f32.mrb[37].mxu0 }
 0x195   : > { %v760_v0 = vpop.f32.mrb[38].mxu1  ;;  %v873_v23 = vpop.f32.mrb[38].mxu0 }
 0x196   : > { %1009 = vst [vmem:[%s1790_s25 + $0x40] sm:$0xff] %v993_v1  ;;  %v994_v4 = vadd.f32 %v1787_v54, %v971_v3  ;;  %v940_v8 = vmax.f32 %v924_v6, %v758_v62  ;;  %v925_v12 = vmax.f32 %v909_v15, %v760_v0  ;;  %v762_v14 = vpop.f32.mrb[39].mxu1  ;;  %v875_v18 = vpop.f32.mrb[39].mxu0 }
 0x198   : > { %1010 = vst [vmem:[%s1790_s25 + $0x48] sm:$0xff] %v994_v4  ;;  %v956_v24 = vmax.f32 %v940_v8, %v869_v63  ;;  %v941_v26 = vmax.f32 %v925_v12, %v762_v14 }
 0x19a   : > { %v972_v5 = vmax.f32 %v956_v24, %v871_v2  ;;  %v957_v7 = vmax.f32 %v941_v26, %v873_v23 }
 0x19b   : > { %v766_v9 = vpop.f32.mrb[40].mxu1  ;;  %v879_v28 = vpop.f32.mrb[40].mxu0 }
 0x19c   : > { %v995_v20 = vadd.f32 %v1787_v54, %v972_v5  ;;  %v973_v41 = vmax.f32 %v957_v7, %v875_v18  ;;  %v926_v42 = vmax.f32 %v910_v21, %v766_v9  ;;  %v768_v10 = vpop.f32.mrb[41].mxu1  ;;  %v881_v13 = vpop.f32.mrb[41].mxu0 }
 0x19d   : > { %v770_v15 = vpop.f32.mrb[42].mxu1  ;;  %v883_v43 = vpop.f32.mrb[42].mxu0 }
 0x19e   : > { %1011 = vst [vmem:[%s1790_s25 + $0x50] sm:$0xff] %v995_v20  ;;  %v996_v44 = vadd.f32 %v1787_v54, %v973_v41  ;;  %v942_v11 = vmax.f32 %v926_v42, %v768_v10  ;;  %v927_v45 = vmax.f32 %v911_v27, %v770_v15  ;;  %v772_v46 = vpop.f32.mrb[43].mxu1  ;;  %v885_v30 = vpop.f32.mrb[43].mxu0 }
 0x1a0   : > { %1012 = vst [vmem:[%s1790_s25 + $0x58] sm:$0xff] %v996_v44  ;;  %v958_v32 = vmax.f32 %v942_v11, %v879_v28  ;;  %v943_v35 = vmax.f32 %v927_v45, %v772_v46 }
 0x1a2   : > { %v974_v17 = vmax.f32 %v958_v32, %v881_v13  ;;  %v959_v19 = vmax.f32 %v943_v35, %v883_v43 }
 0x1a3   : > { %v776_v21 = vpop.f32.mrb[44].mxu1  ;;  %v889_v47 = vpop.f32.mrb[44].mxu0 }
 0x1a4   : > { %v997_v48 = vadd.f32 %v1787_v54, %v974_v17  ;;  %v975_v49 = vmax.f32 %v959_v19, %v885_v30  ;;  %v928_v50 = vmax.f32 %v912_v33, %v776_v21  ;;  %v778_v22 = vpop.f32.mrb[45].mxu1  ;;  %v891_v25 = vpop.f32.mrb[45].mxu0 }
 0x1a5   : > { %v780_v27 = vpop.f32.mrb[46].mxu1  ;;  %v893_v36 = vpop.f32.mrb[46].mxu0 }
 0x1a6   : > { %1013 = vst [vmem:[%s1790_s25 + $0x60] sm:$0xff] %v997_v48  ;;  %v998_v38 = vadd.f32 %v1787_v54, %v975_v49  ;;  %v944_v40 = vmax.f32 %v928_v50, %v778_v22  ;;  %v929_v51 = vmax.f32 %v913_v39, %v780_v27  ;;  %v782_v52 = vpop.f32.mrb[47].mxu1  ;;  %v895_v29 = vpop.f32.mrb[47].mxu0 }
 0x1a8   : > { %1014 = vst [vmem:[%s1790_s25 + $0x68] sm:$0xff] %v998_v38  ;;  %v960_v31 = vmax.f32 %v944_v40, %v889_v47  ;;  %v945_v33 = vmax.f32 %v929_v51, %v782_v52 }
 0x1aa   : > { %v976_v53 = vmax.f32 %v960_v31, %v891_v25  ;;  %v961_v55 = vmax.f32 %v945_v33, %v893_v36 }
 0x1ac   : > { %v999_v16 = vadd.f32 %v1787_v54, %v976_v53  ;;  %v977_v56 = vmax.f32 %v961_v55, %v895_v29 }
 0x1ae   : > { %1015 = vst [vmem:[%s1790_s25 + $0x70] sm:$0xff] %v999_v16  ;;  %v1000_v34 = vadd.f32 %v1787_v54, %v977_v56 }
 0x1b0   : > { %1016 = vst [vmem:[%s1790_s25 + $0x78] sm:$0xff] %v1000_v34 }
 0x1b1   : > { %1420 = shalt.err (!%p1417_p7)
}
 0x1b2   : > { %s1421_s22 = scalar_lea.hbm %s1858_s27, 2048  ;;  %s1425_s9 = scalar_lea.hbm %s1909_s3, 8192 }
 0x1b3   : > { %p1422_p9 = scmp.ne.s32.totalorder %s1858_s27, %s1421_s22  ;;  %p1426_p5 = scmp.lt.u32.totalorder %s1858_s27, %s1909_s3 }
 0x1b4   : > { %p1427_p10 = scmp.lt.u32.totalorder %s1425_s9, %s1421_s22  ;;  %p1429_p1 = scmp.lt.u32.totalorder %s1421_s22, %s1858_s27 }
 0x1b5   : > { %p1423_p11 = pnand %p1422_p9, %p1592_p12 }
 0x1b6   : > { %p1428_p2 = por %p1427_p10, %p1426_p5 }
 0x1b7   : > { %p1424_p0 = pneg %p1423_p11 }
 0x1b8   : > { %p1430_p4 = por %p1429_p1, %p1428_p2 }
 0x1ba   : > { %p1431_p6 = pnand %p1430_p4, %p1424_p0 }
 0x1bc   : > { %1434 = shalt.err (!%p1431_p6)
}
 0x1bd   : > { %s1487_s4 = smov 128   ;;  %s1488_s25 = smov 8  }
 0x1be   : > { %1211 = dma.vmem_to_hbm [thread:$0]  (%p1592_p12), %s1860_s5, 2048, %s1858_s27, %s1018_s28, %s1487_s4, %s1487_s4, %s1488_s25  }
 0x1bf PF: > { %p1228_p8 = scmp.ge.s32.totalorder %s1477_s15, 2  ;;  %s1046_s26 = sand.u32 1, %s1465_s12  }
 0x1c0   : > { %p1924_p13 = scmp.ne.s32.totalorder %s1914_s19, 0  ;;  %s1047_s10 = scalar_lea.sflag [#allocation4], %s1046_s26 }
 0x1c2   : > { %p1222_p3 = pnand %p1228_p8, %p1924_p13 }
 0x1c4   : > { %1460 = dma.done.wait (!%p1222_p3), %s1047_s10, 2048  }
 0x1c5   : > { %1462 = vsyncadd (!%p1222_p3), %s1047_s10, 4294965248  ;;  %p17_p7 = scmp.ge.s32.totalorder %s1562_s24, 6   ;;  %s1925_s12 = smov %s1469_s13 }
 0x1c6   : > { %s1926_s13 = smov %s1473_s14  ;;  %s1927_s14 = smov %s1588_s17 }
 0x1c7   : > { %s1928_s15 = smov %s1562_s24  ;;  %19 = sbr.rel (!%p17_p7) target bundleno = 6 (0x6), region = 81 }
 0x1ce   :  { %1052 = vsyncpa [#allocation3], 1 }
 0x1cf   :  { %1054 = vsyncpa [#allocation3 + $0x1], 1 }
 0x1d0   :  { %1055 = vsyncpa [#allocation6], 1 }
 0x1d1   :  { %1056 = vsyncpa [#allocation4], 1 }
 0x1d2   :  { %1058 = vsyncpa [#allocation4 + $0x1], 1 }

</bundles_post_ra>
